<compile_context>
chip_gen: v6e
topology: v6e:2x2x1
jax: 0.10.0
libtpu: 0.0.40
codegen_flags: <defaults>
</compile_context>

<pallas_src>
import functools

import numpy as np
import jax
import jax.numpy as jnp
from jax.experimental import pallas as pl
from jax.experimental.pallas import tpu as pltpu

MAX_SEQ_LEN = 1024
EOS_TOKEN = 50256                      # padding / eos token id used for the attention mask
_VMEM_LIMIT = 48 * 1024 * 1024         # explicit scoped-VMEM budget; fits v5e/v6e/v7x


def _fit_tile(n, preferred):
    """Use `preferred` if it evenly divides n, otherwise fall back to the full extent."""
    return preferred if (n % preferred == 0) else n


# ----------------------------------------------------------------------------
# Kernels
# ----------------------------------------------------------------------------
def _layernorm(x, g, b, eps=1e-5):
    mu = jnp.mean(x, axis=-1, keepdims=True)
    var = jnp.mean((x - mu) ** 2, axis=-1, keepdims=True)
    return (x - mu) * jax.lax.rsqrt(var + eps) * g + b


def _ln_qkv_kernel(scale,
                   x_ref, g_ref, b_ref,
                   wq_ref, bq_ref, wk_ref, bk_ref, wv_ref, bv_ref,
                   q_out, k_out, v_out):
    """LayerNorm1 + fused Q/K/V projections for one (batch, query-tile) block."""
    xn = _layernorm(x_ref[0], g_ref[0], b_ref[0])
    xb = xn.astype(jnp.bfloat16)                                # bf16 MXU inputs
    q = jnp.dot(xb, wq_ref[...], preferred_element_type=jnp.float32) + bq_ref[0]
    k = jnp.dot(xb, wk_ref[...], preferred_element_type=jnp.float32) + bk_ref[0]
    v = jnp.dot(xb, wv_ref[...], preferred_element_type=jnp.float32) + bv_ref[0]
    q_out[0] = (q * scale).astype(jnp.bfloat16)                 # fold 1/sqrt(d_model) into q
    k_out[0] = k.astype(jnp.bfloat16)
    v_out[0] = v.astype(jnp.bfloat16)


def _attn_mlp_kernel(n_heads, dh, tq, tkv,
                     x_ref, q_ref, k_ref, v_ref, tok_ref,
                     wo_ref, bo_ref, g2_ref, b2_ref, wg_ref, wu_ref, wd_ref,
                     o_ref, m_sc, l_sc, acc_sc):
    """Flash-style attention + output projection + residual + LayerNorm2 + MLP + residual.

    grid = (batch, query-tile, kv-tile); the kv-tile axis is a reduction axis.
    All heads are processed inside the kernel from one (TKV, D) K/V fetch.
    """
    qi = pl.program_id(1)
    ki = pl.program_id(2)
    n_kv = pl.num_programs(2)
    neg_inf = jnp.float32(-jnp.inf)

    @pl.when(ki == 0)
    def _init():
        m_sc[...] = jnp.full_like(m_sc, -jnp.inf)
        l_sc[...] = jnp.zeros_like(l_sc)
        acc_sc[...] = jnp.zeros_like(acc_sc)

    # Skip KV tiles that lie entirely in the causal future of this query tile.
    @pl.when(ki * tkv < (qi + 1) * tq)
    def _online_softmax_step():
        q_all = q_ref[0]                                        # (TQ,  D) bf16, pre-scaled
        k_all = k_ref[0]                                        # (TKV, D) bf16
        v_all = v_ref[0]                                        # (TKV, D) bf16

        # single combined causal + padding additive bias, shared by all heads
        q_pos = qi * tq + jax.lax.broadcasted_iota(jnp.int32, (tq, tkv), 0)
        k_pos = ki * tkv + jax.lax.broadcasted_iota(jnp.int32, (tq, tkv), 1)
        pad = tok_ref[0] == EOS_TOKEN                           # (1, TKV) key-position mask
        visible = jnp.logical_and(k_pos <= q_pos, jnp.logical_not(pad))
        bias = jnp.where(visible, jnp.float32(0.0), neg_inf)

        for h in range(n_heads):                                # static unroll, small n_heads
            lo, hi = h * dh, (h + 1) * dh
            s = jnp.dot(q_all[:, lo:hi], k_all[:, lo:hi].T,
                        preferred_element_type=jnp.float32) + bias      # (TQ, TKV) f32
            m_prev = m_sc[h]
            m_new = jnp.maximum(m_prev, jnp.max(s, axis=-1, keepdims=True))
            alpha = jnp.exp(m_prev - m_new)
            p = jnp.exp(s - m_new)
            l_sc[h] = alpha * l_sc[h] + jnp.sum(p, axis=-1, keepdims=True)
            acc_sc[h] = alpha * acc_sc[h] + jnp.dot(
                p.astype(jnp.bfloat16), v_all[:, lo:hi],
                preferred_element_type=jnp.float32)
            m_sc[h] = m_new

    @pl.when(ki == n_kv - 1)
    def _finish_layer():
        # normalize each head, lane-concat to (TQ, D), single W_o matmul
        heads = [acc_sc[h] * pl.reciprocal(l_sc[h], approx=True)
                 for h in range(n_heads)]
        attn = jnp.concatenate(heads, axis=-1).astype(jnp.bfloat16)     # (TQ, D) bf16
        proj = jnp.dot(attn, wo_ref[...],
                       preferred_element_type=jnp.float32) + bo_ref[0]
        x = x_ref[0]                                            # (TQ, D) residual input
        h1 = x + proj                                           # residual after attention
        hn = _layernorm(h1, g2_ref[0], b2_ref[0])               # norm2
        hb = hn.astype(jnp.bfloat16)
        gate = jnp.dot(hb, wg_ref[...], preferred_element_type=jnp.float32)
        up = jnp.dot(hb, wu_ref[...], preferred_element_type=jnp.float32)
        act = jax.nn.gelu(gate, approximate=False) * up         # exact (erf) GELU
        down = jnp.dot(act.astype(jnp.bfloat16), wd_ref[...],
                       preferred_element_type=jnp.float32)
        o_ref[0] = h1 + down                                    # residual after MLP


def _lm_head_kernel(x_ref, g_ref, b_ref, w_ref, bias_ref, o_ref):
    """Final LayerNorm + lm_head for one (batch, vocab-tile) block."""
    xn = _layernorm(x_ref[0], g_ref[0], b_ref[0])
    o_ref[0] = jnp.dot(xn.astype(jnp.bfloat16), w_ref[...],
                       preferred_element_type=jnp.float32) + bias_ref[0]


# ----------------------------------------------------------------------------
# Wrappers (pallas_call plumbing)
# ----------------------------------------------------------------------------
def _compiler_params(*sems):
    return pltpu.CompilerParams(dimension_semantics=sems,
                                vmem_limit_bytes=_VMEM_LIMIT)


def _ln_qkv(x, lp, lp_bf, d_model, tq):
    B, S, D = x.shape
    nq = S // tq
    scale = 1.0 / float(d_model) ** 0.5
    kernel = functools.partial(_ln_qkv_kernel, scale)

    def const(shape):
        return pl.BlockSpec(shape, lambda b, i: (0, 0))

    in_specs = [
        pl.BlockSpec((1, tq, D), lambda b, i: (b, i, 0)),       # x
        const((1, D)), const((1, D)),                           # g1, b1
        const((D, D)), const((1, D)),                           # wq, bq
        const((D, D)), const((1, D)),                           # wk, bk
        const((D, D)), const((1, D)),                           # wv, bv
    ]
    out_spec = pl.BlockSpec((1, tq, D), lambda b, i: (b, i, 0))
    return pl.pallas_call(
        kernel,
        out_shape=[jax.ShapeDtypeStruct((B, S, D), jnp.bfloat16)] * 3,
        grid=(B, nq),
        in_specs=in_specs,
        out_specs=[out_spec] * 3,
        compiler_params=_compiler_params("parallel", "parallel"),
    )(x, lp["g1"], lp["b1"], lp_bf["wq"], lp["bq"], lp_bf["wk"], lp["bk"],
      lp_bf["wv"], lp["bv"])


def _attn_mlp(x, q, k, v, tok3, lp, lp_bf, n_heads, tq, tkv):
    B, S, D = x.shape
    dh = D // n_heads
    I = lp["wg"].shape[1]
    nq, nkv = S // tq, S // tkv
    kernel = functools.partial(_attn_mlp_kernel, n_heads, dh, tq, tkv)

    def const(shape):
        return pl.BlockSpec(shape, lambda b, qi, ki: (0, 0))

    in_specs = [
        pl.BlockSpec((1, tq, D), lambda b, qi, ki: (b, qi, 0)),        # x (residual)
        pl.BlockSpec((1, tq, D), lambda b, qi, ki: (b, qi, 0)),        # q (pre-scaled bf16)
        pl.BlockSpec((1, tkv, D), lambda b, qi, ki: (b, ki, 0)),       # k
        pl.BlockSpec((1, tkv, D), lambda b, qi, ki: (b, ki, 0)),       # v
        pl.BlockSpec((1, 1, tkv), lambda b, qi, ki: (b, 0, ki)),       # raw token ids
        const((D, D)), const((1, D)), const((1, D)), const((1, D)),    # wo, bo, g2, b2
        const((D, I)), const((D, I)), const((I, D)),                   # wg, wu, wd
    ]
    out_spec = pl.BlockSpec((1, tq, D), lambda b, qi, ki: (b, qi, 0))
    scratch = [
        pltpu.VMEM((n_heads, tq, 1), jnp.float32),    # running max   (per head)
        pltpu.VMEM((n_heads, tq, 1), jnp.float32),    # running denom (per head)
        pltpu.VMEM((n_heads, tq, dh), jnp.float32),   # att@V accumulators (per head)
    ]
    return pl.pallas_call(
        kernel,
        out_shape=jax.ShapeDtypeStruct((B, S, D), jnp.float32),
        grid=(B, nq, nkv),
        in_specs=in_specs,
        out_specs=out_spec,
        scratch_shapes=scratch,
        compiler_params=_compiler_params("parallel", "parallel", "arbitrary"),
    )(x, q, k, v, tok3, lp_bf["wo"], lp["bo"], lp["g2"], lp["b2"],
      lp_bf["wg"], lp_bf["wu"], lp_bf["wd"])


def _lm_head(x, params, tv_pref):
    B, S, D = x.shape
    V = params["lm_w"].shape[1]
    tv = _fit_tile(V, tv_pref)
    nv = V // tv
    in_specs = [
        pl.BlockSpec((1, S, D), lambda b, vi: (b, 0, 0)),       # x
        pl.BlockSpec((1, D), lambda b, vi: (0, 0)),             # final LN gamma
        pl.BlockSpec((1, D), lambda b, vi: (0, 0)),             # final LN beta
        pl.BlockSpec((D, tv), lambda b, vi: (0, vi)),           # lm_w vocab tile
        pl.BlockSpec((1, tv), lambda b, vi: (0, vi)),           # lm_b vocab tile
    ]
    return pl.pallas_call(
        _lm_head_kernel,
        out_shape=jax.ShapeDtypeStruct((B, S, V), jnp.float32),
        grid=(B, nv),
        in_specs=in_specs,
        out_specs=pl.BlockSpec((1, S, tv), lambda b, vi: (b, 0, vi)),
        compiler_params=_compiler_params("parallel", "parallel"),
    )(x, params["gf"], params["bf"], params["lm_w"].astype(jnp.bfloat16), params["lm_b"])


def encoder_forward(tokens, params, d_model, n_heads, *,
                    tq_pref=256, tkv_pref=512, tv_pref=2048):
    """Equivalent of Encoder.forward(x, targets=None) -> (logits, None)."""
    B, S = tokens.shape
    tq = _fit_tile(S, tq_pref)
    tkv = _fit_tile(S, tkv_pref)

    tok3 = tokens.reshape(B, 1, S).astype(jnp.int32)            # raw ids, mask built in-kernel
    x = params["emb"][tokens] + params["pe"][:S]                # embedding + sinusoidal PE (glue)

    for lp in params["layers"]:
        lp_bf = {k: lp[k].astype(jnp.bfloat16)
                 for k in ("wq", "wk", "wv", "wo", "wg", "wu", "wd")}
        q, k, v = _ln_qkv(x, lp, lp_bf, d_model, tq)
        # q/k/v stay in (B, S, D); heads are sliced inside the attention kernel,
        # so no head-major transpose / extra HBM round trip is needed.
        x = _attn_mlp(x, q, k, v, tok3, lp, lp_bf, n_heads, tq, tkv)

    logits = _lm_head(x, params, tv_pref)
    # TODO(synk): cross-entropy loss branch (targets path) and generate() top-k sampling loop
    #             are host-side / not implemented here.
    return logits, None


# ----------------------------------------------------------------------------
# Parameters (deterministic synthetic init) and a pure-JAX reference
# ----------------------------------------------------------------------------
def _sinusoidal_pe(d_model):
    position = jnp.arange(MAX_SEQ_LEN, dtype=jnp.float32)[:, None]
    div_term = jnp.exp(jnp.arange(0, d_model, 2, dtype=jnp.float32)
                       * (-jnp.log(jnp.float32(10000.0)) / d_model))
    pe = jnp.zeros((MAX_SEQ_LEN, d_model), jnp.float32)
    pe = pe.at[:, 0::2].set(jnp.sin(position * div_term))
    pe = pe.at[:, 1::2].set(jnp.cos(position * div_term))
    return pe


def init_params(key, vocab, d_model, n_layers):
    D, I = d_model, 4 * d_model

    def w(k, shape, scale=0.02):
        return (scale * jax.random.normal(k, shape)).astype(jnp.float32)

    keys = jax.random.split(key, 3 + n_layers)
    params = {
        "emb": w(keys[0], (vocab, D)),
        "pe": _sinusoidal_pe(D),
        "lm_w": w(keys[1], (D, vocab)),
        "lm_b": w(keys[2], (1, vocab)),
        "gf": jnp.ones((1, D), jnp.float32),
        "bf": jnp.zeros((1, D), jnp.float32),
        "layers": [],
    }
    for li in range(n_layers):
        lk = jax.random.split(keys[3 + li], 12)
        params["layers"].append(dict(
            g1=jnp.ones((1, D), jnp.float32), b1=jnp.zeros((1, D), jnp.float32),
            wq=w(lk[0], (D, D)), bq=w(lk[1], (1, D)),
            wk=w(lk[2], (D, D)), bk=w(lk[3], (1, D)),
            wv=w(lk[4], (D, D)), bv=w(lk[5], (1, D)),
            wo=w(lk[6], (D, D)), bo=w(lk[7], (1, D)),
            g2=jnp.ones((1, D), jnp.float32), b2=jnp.zeros((1, D), jnp.float32),
            wg=w(lk[8], (D, I)), wu=w(lk[9], (D, I)), wd=w(lk[10], (I, D)),
        ))
    return params


def reference_forward(tokens, params, d_model, n_heads):
    """Pure jnp (f32) re-implementation mirroring the PyTorch forward, for validation."""
    B, S = tokens.shape
    dh = d_model // n_heads
    pad = (tokens == EOS_TOKEN)                                  # (B, S)
    causal = jnp.tril(jnp.ones((S, S), bool))
    x = params["emb"][tokens] + params["pe"][:S]

    def ln(x, g, b):
        mu = jnp.mean(x, -1, keepdims=True)
        var = jnp.mean((x - mu) ** 2, -1, keepdims=True)
        return (x - mu) / jnp.sqrt(var + 1e-5) * g + b

    for p in params["layers"]:
        res = x
        xn = ln(x, p["g1"][0], p["b1"][0])
        q = xn @ p["wq"] + p["bq"][0]
        k = xn @ p["wk"] + p["bk"][0]
        v = xn @ p["wv"] + p["bv"][0]
        outs = []
        for h in range(n_heads):
            qh, kh, vh = (t[..., h * dh:(h + 1) * dh] for t in (q, k, v))
            att = jnp.einsum("bqd,bkd->bqk", qh, kh)
            att = jnp.where(causal, att, -jnp.inf)
            att = att / d_model ** 0.5
            att = jnp.where(pad[:, None, :], -jnp.inf, att)
            att = jax.nn.softmax(att, axis=-1)
            outs.append(jnp.einsum("bqk,bkd->bqd", att, vh))
        x = res + (jnp.concatenate(outs, -1) @ p["wo"] + p["bo"][0])
        res = x
        xn = ln(x, p["g2"][0], p["b2"][0])
        act = jax.nn.gelu(xn @ p["wg"], approximate=False) * (xn @ p["wu"])
        x = res + act @ p["wd"]
    x = ln(x, params["gf"][0], params["bf"][0])
    return x @ params["lm_w"] + params["lm_b"][0]


# ----------------------------------------------------------------------------
if __name__ == "__main__":
    B, S = 2, 8
    d_model, n_heads, n_layers, vocab = 32, 4, 2, 128

    key = jax.random.PRNGKey(0)
    k_params, k_tok = jax.random.split(key)
    params = init_params(k_params, vocab, d_model, n_layers)
    tokens = jax.random.randint(k_tok, (B, S), 0, vocab, dtype=jnp.int32)

    logits, loss = encoder_forward(tokens, params, d_model, n_heads)
    logits = jax.block_until_ready(logits)
    assert logits.shape == (B, S, vocab) and loss is None

    ref = reference_forward(tokens, params, d_model, n_heads)
    np.testing.assert_allclose(np.asarray(logits), np.asarray(ref), rtol=2e-2, atol=2e-2)

    print("KERNEL_OK")
</pallas_src>

<mosaic_0001>
module attributes {stable_mosaic.version = 11 : i64} {
  func.func @_ln_qkv_kernel(%arg0: i32, %arg1: i32, %arg2: memref<1x8x32xf32, #tpu.memory_space<vmem>>, %arg3: memref<1x32xf32, #tpu.memory_space<vmem>>, %arg4: memref<1x32xf32, #tpu.memory_space<vmem>>, %arg5: memref<32x32xbf16, #tpu.memory_space<vmem>>, %arg6: memref<1x32xf32, #tpu.memory_space<vmem>>, %arg7: memref<32x32xbf16, #tpu.memory_space<vmem>>, %arg8: memref<1x32xf32, #tpu.memory_space<vmem>>, %arg9: memref<32x32xbf16, #tpu.memory_space<vmem>>, %arg10: memref<1x32xf32, #tpu.memory_space<vmem>>, %arg11: memref<1x8x32xbf16, #tpu.memory_space<vmem>>, %arg12: memref<1x8x32xbf16, #tpu.memory_space<vmem>>, %arg13: memref<1x8x32xbf16, #tpu.memory_space<vmem>>) attributes {dimension_semantics = [#tpu.dimension_semantics<parallel>, #tpu.dimension_semantics<parallel>], iteration_bounds = array<i64: 2, 1>, scalar_prefetch = 0 : i64, scratch_operands = 0 : i64, tpu.core_type = #tpu.core_type<tc>, window_params = [{transform_indices = @transform_0, window_bounds = array<i64: 1, 8, 32>}, {pipeline_mode = #tpu.pipeline_mode<synchronous>, transform_indices = @transform_1, window_bounds = array<i64: 1, 32>}, {pipeline_mode = #tpu.pipeline_mode<synchronous>, transform_indices = @transform_2, window_bounds = array<i64: 1, 32>}, {pipeline_mode = #tpu.pipeline_mode<synchronous>, transform_indices = @transform_3, window_bounds = array<i64: 32, 32>}, {pipeline_mode = #tpu.pipeline_mode<synchronous>, transform_indices = @transform_4, window_bounds = array<i64: 1, 32>}, {pipeline_mode = #tpu.pipeline_mode<synchronous>, transform_indices = @transform_5, window_bounds = array<i64: 32, 32>}, {pipeline_mode = #tpu.pipeline_mode<synchronous>, transform_indices = @transform_6, window_bounds = array<i64: 1, 32>}, {pipeline_mode = #tpu.pipeline_mode<synchronous>, transform_indices = @transform_7, window_bounds = array<i64: 32, 32>}, {pipeline_mode = #tpu.pipeline_mode<synchronous>, transform_indices = @transform_8, window_bounds = array<i64: 1, 32>}, {transform_indices = @transform_9, window_bounds = array<i64: 1, 8, 32>}, {transform_indices = @transform_10, window_bounds = array<i64: 1, 8, 32>}, {transform_indices = @transform_11, window_bounds = array<i64: 1, 8, 32>}]} {
    %c0 = arith.constant 0 : index
    %c0_0 = arith.constant 0 : index
    %c0_1 = arith.constant 0 : index
    %0 = vector.load %arg2[%c0, %c0_0, %c0_1] : memref<1x8x32xf32, #tpu.memory_space<vmem>>, vector<1x8x32xf32>
    %1 = vector.shape_cast %0 : vector<1x8x32xf32> to vector<8x32xf32>
    %c0_2 = arith.constant 0 : index
    %c0_3 = arith.constant 0 : index
    %2 = vector.load %arg3[%c0_2, %c0_3] : memref<1x32xf32, #tpu.memory_space<vmem>>, vector<1x32xf32>
    %3 = vector.shape_cast %2 : vector<1x32xf32> to vector<32xf32>
    %c0_4 = arith.constant 0 : index
    %c0_5 = arith.constant 0 : index
    %4 = vector.load %arg4[%c0_4, %c0_5] : memref<1x32xf32, #tpu.memory_space<vmem>>, vector<1x32xf32>
    %5 = vector.shape_cast %4 : vector<1x32xf32> to vector<32xf32>
    %cst = arith.constant dense<0.000000e+00> : vector<8xf32>
    %6 = vector.multi_reduction <add>, %1, %cst [1] : vector<8x32xf32> to vector<8xf32>
    %7 = vector.shape_cast %6 : vector<8xf32> to vector<8x1xf32>
    %cst_6 = arith.constant 3.200000e+01 : f32
    %8 = vector.broadcast %cst_6 : f32 to vector<8x1xf32>
    %9 = arith.divf %7, %8 : vector<8x1xf32>
    %10 = vector.broadcast %9 : vector<8x1xf32> to vector<8x32xf32>
    %11 = arith.subf %1, %10 : vector<8x32xf32>
    %12 = arith.mulf %11, %11 : vector<8x32xf32>
    %cst_7 = arith.constant dense<0.000000e+00> : vector<8xf32>
    %13 = vector.multi_reduction <add>, %12, %cst_7 [1] : vector<8x32xf32> to vector<8xf32>
    %14 = vector.shape_cast %13 : vector<8xf32> to vector<8x1xf32>
    %cst_8 = arith.constant 3.200000e+01 : f32
    %15 = vector.broadcast %cst_8 : f32 to vector<8x1xf32>
    %16 = arith.divf %14, %15 : vector<8x1xf32>
    %17 = vector.broadcast %9 : vector<8x1xf32> to vector<8x32xf32>
    %18 = arith.subf %1, %17 : vector<8x32xf32>
    %cst_9 = arith.constant 9.99999974E-6 : f32
    %19 = vector.broadcast %cst_9 : f32 to vector<8x1xf32>
    %20 = arith.addf %16, %19 : vector<8x1xf32>
    %21 = math.rsqrt %20 : vector<8x1xf32>
    %22 = vector.broadcast %21 : vector<8x1xf32> to vector<8x32xf32>
    %23 = arith.mulf %18, %22 : vector<8x32xf32>
    %24 = vector.shape_cast %3 : vector<32xf32> to vector<1x32xf32>
    %25 = vector.broadcast %24 : vector<1x32xf32> to vector<8x32xf32>
    %26 = arith.mulf %23, %25 : vector<8x32xf32>
    %27 = vector.shape_cast %5 : vector<32xf32> to vector<1x32xf32>
    %28 = vector.broadcast %27 : vector<1x32xf32> to vector<8x32xf32>
    %29 = arith.addf %26, %28 : vector<8x32xf32>
    %30 = arith.truncf %29 : vector<8x32xf32> to vector<8x32xbf16>
    %c0_10 = arith.constant 0 : index
    %c0_11 = arith.constant 0 : index
    %31 = vector.load %arg5[%c0_10, %c0_11] : memref<32x32xbf16, #tpu.memory_space<vmem>>, vector<32x32xbf16>
    %cst_12 = arith.constant dense<0.000000e+00> : vector<8x32xf32>
    %32 = tpu.matmul %30, %31, %cst_12 {dimension_numbers = #tpu.dot_dimension_numbers<[1], [0], [0], [1], [0, 0, 1, 1], [], []>} : vector<8x32xbf16>, vector<32x32xbf16>, vector<8x32xf32> -> vector<8x32xf32>
    %c0_13 = arith.constant 0 : index
    %c0_14 = arith.constant 0 : index
    %33 = vector.load %arg6[%c0_13, %c0_14] : memref<1x32xf32, #tpu.memory_space<vmem>>, vector<1x32xf32>
    %34 = vector.shape_cast %33 : vector<1x32xf32> to vector<32xf32>
    %35 = vector.shape_cast %34 : vector<32xf32> to vector<1x32xf32>
    %36 = vector.broadcast %35 : vector<1x32xf32> to vector<8x32xf32>
    %37 = arith.addf %32, %36 : vector<8x32xf32>
    %c0_15 = arith.constant 0 : index
    %c0_16 = arith.constant 0 : index
    %38 = vector.load %arg7[%c0_15, %c0_16] : memref<32x32xbf16, #tpu.memory_space<vmem>>, vector<32x32xbf16>
    %cst_17 = arith.constant dense<0.000000e+00> : vector<8x32xf32>
    %39 = tpu.matmul %30, %38, %cst_17 {dimension_numbers = #tpu.dot_dimension_numbers<[1], [0], [0], [1], [0, 0, 1, 1], [], []>} : vector<8x32xbf16>, vector<32x32xbf16>, vector<8x32xf32> -> vector<8x32xf32>
    %c0_18 = arith.constant 0 : index
    %c0_19 = arith.constant 0 : index
    %40 = vector.load %arg8[%c0_18, %c0_19] : memref<1x32xf32, #tpu.memory_space<vmem>>, vector<1x32xf32>
    %41 = vector.shape_cast %40 : vector<1x32xf32> to vector<32xf32>
    %42 = vector.shape_cast %41 : vector<32xf32> to vector<1x32xf32>
    %43 = vector.broadcast %42 : vector<1x32xf32> to vector<8x32xf32>
    %44 = arith.addf %39, %43 : vector<8x32xf32>
    %c0_20 = arith.constant 0 : index
    %c0_21 = arith.constant 0 : index
    %45 = vector.load %arg9[%c0_20, %c0_21] : memref<32x32xbf16, #tpu.memory_space<vmem>>, vector<32x32xbf16>
    %cst_22 = arith.constant dense<0.000000e+00> : vector<8x32xf32>
    %46 = tpu.matmul %30, %45, %cst_22 {dimension_numbers = #tpu.dot_dimension_numbers<[1], [0], [0], [1], [0, 0, 1, 1], [], []>} : vector<8x32xbf16>, vector<32x32xbf16>, vector<8x32xf32> -> vector<8x32xf32>
    %c0_23 = arith.constant 0 : index
    %c0_24 = arith.constant 0 : index
    %47 = vector.load %arg10[%c0_23, %c0_24] : memref<1x32xf32, #tpu.memory_space<vmem>>, vector<1x32xf32>
    %48 = vector.shape_cast %47 : vector<1x32xf32> to vector<32xf32>
    %49 = vector.shape_cast %48 : vector<32xf32> to vector<1x32xf32>
    %50 = vector.broadcast %49 : vector<1x32xf32> to vector<8x32xf32>
    %51 = arith.addf %46, %50 : vector<8x32xf32>
    %cst_25 = arith.constant 0.176776692 : f32
    %52 = vector.broadcast %cst_25 : f32 to vector<8x32xf32>
    %53 = arith.mulf %37, %52 : vector<8x32xf32>
    %54 = arith.truncf %53 : vector<8x32xf32> to vector<8x32xbf16>
    %c0_26 = arith.constant 0 : index
    %c0_27 = arith.constant 0 : index
    %c0_28 = arith.constant 0 : index
    %55 = vector.load %arg11[%c0_26, %c0_27, %c0_28] : memref<1x8x32xbf16, #tpu.memory_space<vmem>>, vector<1x8x32xbf16>
    %56 = vector.shape_cast %55 : vector<1x8x32xbf16> to vector<8x32xbf16>
    %57 = vector.shape_cast %54 : vector<8x32xbf16> to vector<1x8x32xbf16>
    tpu.vector_store %arg11[%c0_26, %c0_27, %c0_28], %57 {strides = array<i32>} : memref<1x8x32xbf16, #tpu.memory_space<vmem>>, vector<1x8x32xbf16>,
    %58 = arith.truncf %44 : vector<8x32xf32> to vector<8x32xbf16>
    %c0_29 = arith.constant 0 : index
    %c0_30 = arith.constant 0 : index
    %c0_31 = arith.constant 0 : index
    %59 = vector.load %arg12[%c0_29, %c0_30, %c0_31] : memref<1x8x32xbf16, #tpu.memory_space<vmem>>, vector<1x8x32xbf16>
    %60 = vector.shape_cast %59 : vector<1x8x32xbf16> to vector<8x32xbf16>
    %61 = vector.shape_cast %58 : vector<8x32xbf16> to vector<1x8x32xbf16>
    tpu.vector_store %arg12[%c0_29, %c0_30, %c0_31], %61 {strides = array<i32>} : memref<1x8x32xbf16, #tpu.memory_space<vmem>>, vector<1x8x32xbf16>,
    %62 = arith.truncf %51 : vector<8x32xf32> to vector<8x32xbf16>
    %c0_32 = arith.constant 0 : index
    %c0_33 = arith.constant 0 : index
    %c0_34 = arith.constant 0 : index
    %63 = vector.load %arg13[%c0_32, %c0_33, %c0_34] : memref<1x8x32xbf16, #tpu.memory_space<vmem>>, vector<1x8x32xbf16>
    %64 = vector.shape_cast %63 : vector<1x8x32xbf16> to vector<8x32xbf16>
    %65 = vector.shape_cast %62 : vector<8x32xbf16> to vector<1x8x32xbf16>
    tpu.vector_store %arg13[%c0_32, %c0_33, %c0_34], %65 {strides = array<i32>} : memref<1x8x32xbf16, #tpu.memory_space<vmem>>, vector<1x8x32xbf16>,
    return
  }
  func.func @transform_0(%arg0: i32, %arg1: i32) -> (i32, i32, i32) {
    %c0_i32 = arith.constant 0 : i32
    %c0_i32_0 = arith.constant 0 : i32
    return %arg0, %arg1, %c0_i32 : i32, i32, i32
  }
  func.func @transform_1(%arg0: i32, %arg1: i32) -> (i32, i32) {
    %c0_i32 = arith.constant 0 : i32
    %c0_i32_0 = arith.constant 0 : i32
    %c0_i32_1 = arith.constant 0 : i32
    return %c0_i32, %c0_i32_0 : i32, i32
  }
  func.func @transform_2(%arg0: i32, %arg1: i32) -> (i32, i32) {
    %c0_i32 = arith.constant 0 : i32
    %c0_i32_0 = arith.constant 0 : i32
    %c0_i32_1 = arith.constant 0 : i32
    return %c0_i32, %c0_i32_0 : i32, i32
  }
  func.func @transform_3(%arg0: i32, %arg1: i32) -> (i32, i32) {
    %c0_i32 = arith.constant 0 : i32
    %c0_i32_0 = arith.constant 0 : i32
    %c0_i32_1 = arith.constant 0 : i32
    return %c0_i32, %c0_i32_0 : i32, i32
  }
  func.func @transform_4(%arg0: i32, %arg1: i32) -> (i32, i32) {
    %c0_i32 = arith.constant 0 : i32
    %c0_i32_0 = arith.constant 0 : i32
    %c0_i32_1 = arith.constant 0 : i32
    return %c0_i32, %c0_i32_0 : i32, i32
  }
  func.func @transform_5(%arg0: i32, %arg1: i32) -> (i32, i32) {
    %c0_i32 = arith.constant 0 : i32
    %c0_i32_0 = arith.constant 0 : i32
    %c0_i32_1 = arith.constant 0 : i32
    return %c0_i32, %c0_i32_0 : i32, i32
  }
  func.func @transform_6(%arg0: i32, %arg1: i32) -> (i32, i32) {
    %c0_i32 = arith.constant 0 : i32
    %c0_i32_0 = arith.constant 0 : i32
    %c0_i32_1 = arith.constant 0 : i32
    return %c0_i32, %c0_i32_0 : i32, i32
  }
  func.func @transform_7(%arg0: i32, %arg1: i32) -> (i32, i32) {
    %c0_i32 = arith.constant 0 : i32
    %c0_i32_0 = arith.constant 0 : i32
    %c0_i32_1 = arith.constant 0 : i32
    return %c0_i32, %c0_i32_0 : i32, i32
  }
  func.func @transform_8(%arg0: i32, %arg1: i32) -> (i32, i32) {
    %c0_i32 = arith.constant 0 : i32
    %c0_i32_0 = arith.constant 0 : i32
    %c0_i32_1 = arith.constant 0 : i32
    return %c0_i32, %c0_i32_0 : i32, i32
  }
  func.func @transform_9(%arg0: i32, %arg1: i32) -> (i32, i32, i32) {
    %c0_i32 = arith.constant 0 : i32
    %c0_i32_0 = arith.constant 0 : i32
    return %arg0, %arg1, %c0_i32 : i32, i32, i32
  }
  func.func @transform_10(%arg0: i32, %arg1: i32) -> (i32, i32, i32) {
    %c0_i32 = arith.constant 0 : i32
    %c0_i32_0 = arith.constant 0 : i32
    return %arg0, %arg1, %c0_i32 : i32, i32, i32
  }
  func.func @transform_11(%arg0: i32, %arg1: i32) -> (i32, i32, i32) {
    %c0_i32 = arith.constant 0 : i32
    %c0_i32_0 = arith.constant 0 : i32
    return %arg0, %arg1, %c0_i32 : i32, i32, i32
  }
}

</mosaic_0001>

<bundles_post_ra>
// kernel: tpu_custom_call.1
= control target key start
LH: loop header
LB: loop body
LE: loop exit
PB: predicated region body
PF: predicated region fallthrough
CT: control target
= control target key end

     0   :  { %s1753_s0 = inlined_call_operand.hbm [shape: f32[2,8,32], index: 0, kind: input, shape index: {}]   ;;  %s1754_s1 = inlined_call_operand.vmem [shape: f32[1,32], index: 1, kind: input, shape index: {}]   ;;  %s1755_s2 = inlined_call_operand.vmem [shape: f32[1,32], index: 2, kind: input, shape index: {}]   ;;  %s1756_s3 = inlined_call_operand.hbm [shape: bf16[32,32], index: 3, kind: input, shape index: {}]   ;;  %s1757_s4 = inlined_call_operand.vmem [shape: f32[1,32], index: 4, kind: input, shape index: {}]   ;;  %s1758_s5 = inlined_call_operand.hbm [shape: bf16[32,32], index: 5, kind: input, shape index: {}]   ;;  %s1759_s6 = inlined_call_operand.vmem [shape: f32[1,32], index: 6, kind: input, shape index: {}]   ;;  %s1760_s7 = inlined_call_operand.hbm [shape: bf16[32,32], index: 7, kind: input, shape index: {}]   ;;  %s1761_s8 = inlined_call_operand.vmem [shape: f32[1,32], index: 8, kind: input, shape index: {}]   ;;  %s1762_s9 = inlined_call_operand.hbm [shape: bf16[2,8,32], index: 9, kind: output, shape index: {0}]   ;;  %s1763_s10 = inlined_call_operand.hbm [shape: bf16[2,8,32], index: 10, kind: output, shape index: {1}]   ;;  %s1764_s11 = inlined_call_operand.hbm [shape: bf16[2,8,32], index: 11, kind: output, shape index: {2}]  }
   0x1   :  { %1773 = sst [smem:[#allocation22_spill]] %s1756_s3 }
   0x2   :  { %1774 = sst [smem:[#allocation23_spill]] %s1758_s5 }
   0x3   :  { %1775 = sst [smem:[#allocation24_spill]] %s1760_s7 }
   0x4   :  { %1776 = sst [smem:[#allocation25_spill]] %s1764_s11 }
   0x5   :  { %17 = vsyncpa [#allocation3], 0 }
   0x6   :  { %19 = vsyncpa [#allocation3 + $0x1], 0 }
   0x7   :  { %20 = vsyncpa [#allocation6], 0 }
   0x8   :  { %21 = vsyncpa [#allocation9], 0 }
   0x9   :  { %22 = vsyncpa [#allocation4], 0 }
   0xa   :  { %24 = vsyncpa [#allocation4 + $0x1], 0 }
   0xb   :  { %25 = vsyncpa [#allocation12], 0 }
   0xc   :  { %27 = vsyncpa [#allocation12 + $0x1], 0  ;;  %s1454_s17 = smov 0   ;;  %s1456_s18 = smov 0  }
   0xd   :  { %s1458_s19 = smov 0   ;;  %s1460_s20 = smov 0  }
   0xe   :  { %s1462_s21 = smov 0   ;;  %s1464_s22 = smov 0  }
   0xf LB: > { %1777 = sst [smem:[#allocation19_spill]] %s1361_s17  ;;  %s1485_s23 = sadd.s32 4294967295, %s1381_s22   ;;  %s1381_s22 = sphi %s1464_s22, %s33_s22   ;;  %s1377_s21 = sphi %s1462_s21, %s1807_s21   ;;  %s1373_s20 = sphi %s1460_s20, %s1806_s20   ;;  %s1369_s19 = sphi %s1458_s19, %s1805_s19   ;;  %s1365_s18 = sphi %s1456_s18, %s1804_s18   ;;  %s1361_s17 = sphi %s1454_s17, %s1803_s17  }
  0x10   : > { %s1765_s24 = sadd.s32 4294967294, %s1381_s22   ;;  %p67_p0 = scmp.ne.s32.totalorder %s1365_s18, %s1361_s17 }
  0x11   : > { %p1767_p1 = scmp.eq.s32.totalorder %s1485_s23, 0  ;;  %p267_p3 = scmp.eq.s32.totalorder %s1765_s24, 1 }
  0x12   : > { %p946_p5 = scmp.ge.s32.totalorder %s1381_s22, 1  ;;  %p330_p7 = scmp.lt.s32.totalorder %s1381_s22, 3 }
  0x13   : > { %p1496_p4 = por %p1767_p1, %p67_p0  ;;  %p1501_p6 = por %p267_p3, %p67_p0 }
  0x14   : > { %p1506_p8 = pnand %p946_p5, %p330_p7  ;;  %s1383_s28 = smov [#allocation5]  }
  0x15   : > { %s1778_s25 = scalar_select %p1496_p4, 1, 0 }
  0x16   : > { %s1779_s26 = scalar_select %p1501_p6, 1, 0 }
  0x17   : > { %s348_s29 = sshll.u32 %s1383_s28, 4  ;;  %p1036_p9 = pneg %p1506_p8  ;;  %s349_s29 = int_to_ptr.vmem [resolvable:$true] %s348_s29 }
  0x18   : > { %1780 = sst [smem:[#allocation20_spill]] %s1779_s26  ;;  %s1384_s12 = smov [#allocation7]  }
  0x19   : > { %p1515_p11 = pnand %p1036_p9, %p1767_p1  ;;  %s364_s13 = sshll.u32 %s1384_s12, 4  ;;  %s365_s13 = int_to_ptr.vmem [resolvable:$true] %s364_s13 }
  0x1a   : > { %s1385_s14 = smov [#allocation8]   ;;  %s1142_s16 = scalar_lea.vmem %s349_s29, 256 }
  0x1b   : > { %s380_s15 = sshll.u32 %s1385_s14, 4  ;;  %p1133_p12 = pneg %p1515_p11  ;;  %s381_s15 = int_to_ptr.vmem [resolvable:$true] %s380_s15 }
  0x1c   : > { %p1143_p13 = scmp.ne.s32.totalorder %s349_s29, %s1142_s16  ;;  %p1150_p5 = scmp.lt.s32.totalorder %s349_s29, %s349_s29 }
  0x1d   : > { %p1151_p7 = scmp.lt.s32.totalorder %s1142_s16, %s1142_s16 }
  0x1e   : > { %p1145_p0 = pnand %p1143_p13, %p1133_p12 }
  0x1f   : > { %p1152_p9 = por %p1151_p7, %p1150_p5 }
  0x20   : > { %p1146_p3 = pneg %p1145_p0 }
  0x22   : > { %p1153_p10 = pnand %p1152_p9, %p1146_p3 }
  0x24   : > { %1156 = shalt.err (!%p1153_p10)
}
  0x25   : > { %s1386_s28 = smov 64   ;;  %s1387_s12 = smov 4  }
  0x26   : > { %s1783_s3 = sld [smem:[#allocation22_spill]]  ;;  %s1168_s26 = scalar_lea.vmem %s365_s13, 256 }
  0x27   : > { %p1169_p1 = scmp.ne.s32.totalorder %s365_s13, %s1168_s26  ;;  %p1176_p2 = scmp.lt.s32.totalorder %s365_s13, %s365_s13 }
  0x28   : > { %p1177_p6 = scmp.lt.s32.totalorder %s1168_s26, %s1168_s26 }
  0x29   : > { %p1171_p13 = pnand %p1169_p1, %p1133_p12 }
  0x2a   : > { %p1178_p5 = por %p1177_p6, %p1176_p2 }
  0x2b   : > { %p1172_p0 = pneg %p1171_p13 }
  0x2c   : > { %1039 = dma.hbm_to_vmem [thread:$0]  (!%p1515_p11), %s1783_s3, 256, %s349_s29, [#allocation6], %s1386_s28, %s1386_s28, %s1387_s12  }
  0x2d   : > { %p1179_p3 = pnand %p1178_p5, %p1172_p0 }
  0x2f   : > { %1182 = shalt.err (!%p1179_p3)
}
  0x30   : > { %s1784_s5 = sld [smem:[#allocation23_spill]]  ;;  %s1194_s24 = scalar_lea.vmem %s381_s15, 256 }
  0x31   : > { %p1195_p10 = scmp.ne.s32.totalorder %s381_s15, %s1194_s24  ;;  %p1202_p9 = scmp.lt.s32.totalorder %s381_s15, %s381_s15 }
  0x32   : > { %p1203_p13 = scmp.lt.s32.totalorder %s1194_s24, %s1194_s24 }
  0x33   : > { %p1197_p7 = pnand %p1195_p10, %p1133_p12 }
  0x34   : > { %p1204_p4 = por %p1203_p13, %p1202_p9 }
  0x35   : > { %p1198_p1 = pneg %p1197_p7 }
  0x36   : > { %1042 = dma.hbm_to_vmem [thread:$0]  (!%p1515_p11), %s1784_s5, 256, %s365_s13, [#allocation6], %s1386_s28, %s1386_s28, %s1387_s12  }
  0x37   : > { %p1205_p2 = pnand %p1204_p4, %p1198_p1 }
  0x39   : > { %1208 = shalt.err (!%p1205_p2)
}
  0x3a   : > { %s1785_s7 = sld [smem:[#allocation24_spill]]  ;;  %s54_s17 = sadd.s32 1, %s1369_s19 }
  0x3b   : > { %s45_s13 = sadd.s32 1, %s1377_s21  ;;  %p61_p4 = scmp.ne.s32.totalorder %s1369_s19, %s1365_s18 }
  0x3c   : > { %p47_p6 = scmp.ge.s32.totalorder %s45_s13, 2  ;;  %p62_p12 = scmp.eq.s32.totalorder %s1381_s22, 0 }
  0x3d   : > { %p1786_p0 = scmp.eq.s32.totalorder %s1485_s23, 1  ;;  %p1063_p3 = scmp.lt.s32.totalorder %s1381_s22, 2 }
  0x3e   : > { %s1809_s13 = smov (%p47_p6, %s45_s13), 0  ;;  %p63_p10 = por %p62_p12, %p61_p4 }
  0x3f   : > { %p1552_p5 = por %p1786_p0, %p61_p4  ;;  %1788 = sst [smem:[#allocation21_spill]] %s1809_s13 }
  0x40   : > { %1045 = dma.hbm_to_vmem [thread:$0]  (!%p1515_p11), %s1785_s7, 256, %s381_s15, [#allocation9], %s1386_s28, %s1386_s28, %s1387_s12  }
  0x41   : > { %s397_s14 = sand.u32 1, %s1369_s19   ;;  %s49_s16 = ssub.s32 %s1377_s21, %s1809_s13 }
  0x42   : > { %p52_p7 = scmp.eq.s32.totalorder %s49_s16, 0  ;;  %s951_s15 = sshll.u32 %s397_s14, 3 }
  0x43   : > { %s952_s28 = sshll.u32 %s1377_s21, 7  ;;  %s401_s3 = scalar_lea.vmem [#allocation2], %s951_s15 }
  0x44   : > { %s1564_s12 = scalar_select %p52_p7, %s1369_s19, %s54_s17  }
  0x45   : > { %s407_s29 = scalar_lea.hbm %s1753_s0, %s952_s28  ;;  %s409_s5 = sshll.u32 %s401_s3, 4  ;;  %s410_s5 = int_to_ptr.vmem [resolvable:$true] %s409_s5 }
  0x46   : > { %p1571_p11 = pnand %p1063_p3, %p63_p10  ;;  %s398_s11 = scalar_lea.sflag [#allocation3], %s397_s14 }
  0x47   : > { %s1222_s16 = scalar_lea.vmem %s410_s5, 128  ;;  %s1388_s17 = smov [#allocation2]  }
  0x48   : > { %p1211_p1 = pneg %p1571_p11  ;;  %p1223_p9 = scmp.ne.s32.totalorder %s410_s5, %s1222_s16 }
  0x49   : > { %s1227_s13 = sshll.u32 %s1388_s17, 4  ;;  %s1228_s13 = int_to_ptr.vmem [resolvable:$false] %s1227_s13 }
  0x4a   : > { %p1225_p13 = pnand %p1223_p9, %p1211_p1  ;;  %s1229_s28 = scalar_lea.vmem %s1228_s13, 256 }
  0x4b   : > { %p1230_p4 = scmp.lt.s32.totalorder %s410_s5, %s1228_s13  ;;  %p1231_p6 = scmp.lt.s32.totalorder %s1229_s28, %s1222_s16 }
  0x4c   : > { %p1226_p2 = pneg %p1225_p13 }
  0x4d   : > { %p1232_p12 = por %p1231_p6, %p1230_p4 }
  0x4f   : > { %p1233_p0 = pnand %p1232_p12, %p1226_p2 }
  0x51   : > { %1236 = shalt.err (!%p1233_p0)
}
  0x52   : > { %1049 = dma.hbm_to_vmem [thread:$0]  (!%p1571_p11), %s407_s29, 128, %s410_s5, %s398_s11  }
  0x53   : > { %418 = sbr.rel (%p1506_p8) target bundleno = 670 (0x29e), region = 56  ;;  %s1582_s3 = sand.u32 (!%p1506_p8), 1, %s1365_s18  }
  0x54   : > { %s954_s14 = sshll.u32 (!%p1506_p8), %s1582_s3, 3  ;;  %s421_s15 = scalar_lea.sflag (!%p1506_p8), [#allocation3], %s1582_s3 }
  0x55   : > { %s424_s24 = scalar_lea.vmem (!%p1506_p8), [#allocation2], %s954_s14  ;;  %p1790_p3 = scmp.ne.s32.totalorder (!%p1506_p8), %s1778_s25, 0 }
  0x58   : > { %1340 = dma.done.wait (%p1790_p3), %s421_s15, 128  }
  0x59   : > { %1342 = vsyncadd (%p1790_p3), %s421_s15, 4294967168  ;;  %p1791_p10 = scmp.eq.s32.totalorder %s1485_s23, 0 }
  0x5b   : > { %1344 = dma.done.wait (%p1791_p10), [#allocation6], 512   ;;  %p1792_p7 = pmov %p1791_p10 }
  0x5d   : > { %1346 = vsyncadd (%p1792_p7), [#allocation6], 4294966784  ;;  %p1793_p8 = pmov %p1792_p7 }
  0x5e   : > { %p1794_p11 = pmov %p1792_p7 }
  0x5f   : > { %1348 = dma.done.wait (%p1793_p8), [#allocation9], 256  }
  0x60   : > { %1350 = vsyncadd (%p1794_p11), [#allocation9], 4294967040  ;;  %vm489_vm0 = vcmask 261120   ;;  %v486_v0 = vld [vmem:[%s424_s24] sm:$0xff]  ;;  %v1123_v7 = vld [vmem:[#allocation5 + $0x8] sm:$0xff]   ;;  %v1389_v9 = vmov 0.0  }
  0x61   : > { %v490_v1 = vsel %vm489_vm0, %v486_v0, 0.0  ;;  %v1124_v8 = vld [vmem:[#allocation7 + $0x8] sm:$0xff]   ;;  %992 = vmatprep.subr.bf16.mxu0 %v1389_v9  ;;  %1000 = vmatprep.subr.bf16.mxu1 %v1389_v9  ;;  %v1125_v10 = vld [vmem:[#allocation5] sm:$0xff]   ;;  %v1126_v11 = vld [vmem:[#allocation7] sm:$0xff]   ;;  %vm1390_vm1 = vmmov 0   ;;  %s1613_s27 = sshll.u32 %s1582_s3, 2 }
  0x62   : > { %491 = vadd.xlane.f32.xlu0 %v490_v1  ;;  %993 = vmatpush3.bf16.msra.mxu0 %v1123_v7  ;;  %v961_v16 = vld [vmem:[%s1754_s1] ss:$0 sm:$0xff]  ;;  %v1127_v21 = vld [vmem:[#allocation8 + $0x8] sm:$0xff]   ;;  %v1128_v23 = vld [vmem:[#allocation8] sm:$0xff]   ;;  %s724_s17 = sand.u32 1, %s1485_s23   ;;  %s1623_s28 = sshll.u32 %s1373_s20, 6 }
  0x63   : > { %1001 = vmatpush3.bf16.msra.mxu1 %v1124_v8  ;;  %994 = vmatprep.subr.bf16.mxu0 %v1389_v9  ;;  %v962_v18 = vld [vmem:[%s1755_s2] ss:$0 sm:$0xff]  ;;  %s477_s14 = scalar_lea.vmem [#allocation11], %s1613_s27  ;;  %vm713_vm2 = vcmask 257024   ;;  %s1772_s24 = scalar_lea.vmem [#allocation10], %s1613_s27 }
  0x64   : > { %1002 = vmatprep.subr.bf16.mxu1 %v1389_v9  ;;  %996 = vmatprep.mubr.msk.bf16.mxu0 %vm1390_vm1, %v1389_v9  ;;  %v963_v24 = vld [vmem:[%s1757_s4] ss:$0 sm:$0xff]  ;;  %s758_s15 = sshll.u32 %s477_s14, 4  ;;  %s744_s5 = sshll.u32 %s1772_s24, 4  ;;  %s1635_s15 = int_to_ptr.vmem [resolvable:$true] %s758_s15  ;;  %s1644_s5 = int_to_ptr.vmem [resolvable:$true] %s744_s5 }
  0x65   : > { %1004 = vmatprep.mubr.msk.bf16.mxu1 %vm1390_vm1, %v1389_v9  ;;  %v967_v25 = vld [vmem:[%s1759_s6] ss:$0 sm:$0xff]  ;;  %s1633_s20 = scalar_lea.hbm %s1763_s10, %s1623_s28  ;;  %s1642_s13 = scalar_lea.hbm %s1762_s9, %s1623_s28 }
  0x66   : > { %995 = vmatpush3.bf16.msra.mxu0 %v1125_v10  ;;  %v971_v39 = vld [vmem:[%s1761_s8] ss:$0 sm:$0xff]  ;;  %s1649_s16 = scalar_lea.sflag [#allocation12], %s724_s17  ;;  %s1237_s23 = scalar_lea.vmem %s1635_s15, 64 }
  0x67   : > { %1003 = vmatpush3.bf16.msra.mxu1 %v1126_v11  ;;  %1008 = vmatprep.subr.bf16.mxu0 %v1389_v9  ;;  %p1238_p1 = scmp.ne.s32.totalorder %s1635_s15, %s1237_s23 }
  0x69   : > { %p1239_p9 = pnand %p1238_p1, %p1552_p5 }
  0x6b   : > { %p1240_p13 = pneg %p1239_p9 }
  0xeb   : > { %v492_v2 = vpop.xlane.xlu0 %491 }
  0xec   : > { %v494_v3 = vmul.f32 0.03125, %v492_v2 }
  0xee   : > { %v495_v4 = vsub.f32 %v486_v0, %v494_v3 }
  0xf0   : > { %v496_v5 = vmul.f32 %v495_v4, %v495_v4 }
  0xf2   : > { %v497_v6 = vsel %vm489_vm0, %v496_v5, 0.0 }
  0xf3   : > { %498 = vadd.xlane.f32.xlu0 %v497_v6 }
 0x17c   : > { %v499_v12 = vpop.xlane.xlu0 %498 }
 0x17d   : > { %v500_v13 = vmul.f32 0.03125, %v499_v12 }
 0x17f   : > { %v501_v14 = vadd.f32 1e-05, %v500_v13 }
 0x181   : > { %1129 = vrsqrt.f32 %v501_v14 }
 0x18e   : > { %v1130_v15 = vpop.eup %1129 }
 0x18f   : > { %v503_v17 = vmul.f32 %v1130_v15, %v495_v4 }
 0x191   : > { %v510_v19 = vmul.f32 %v961_v16, %v503_v17 }
 0x193   : > { %v517_v20 = vadd.f32 %v962_v18, %v510_v19 }
 0x195   : > { %v518_v22 = vpack.c.bf16 %v517_v20, %v517_v20 }
 0x197   : > { %997 = vmatmul.mubr.msk.bf16.vlgmr.msra.gmra.mxu0 %vm489_vm0, %v518_v22  ;;  %1005 = vmatmul.mubr.msk.bf16.vlgmr.msra.gmra.mxu1 %vm489_vm0, %v518_v22 }
 0x198   : > { %1009 = vmatpush3.bf16.msra.mxu0 %v1127_v21  ;;  %1012 = vmatprep.mubr.msk.bf16.mxu0 %vm1390_vm1, %v1389_v9 }
 0x199   : > { %1010 = vmatprep.subr.bf16.mxu0 %v1389_v9 }
 0x19c   : > { %1011 = vmatpush3.bf16.msra.mxu0 %v1128_v23 }
 0x19f   : > { %1013 = vmatmul.mubr.msk.bf16.vlgmr.msra.gmra.mxu0 %vm489_vm0, %v518_v22 }
 0x257   : > { %v579_v26 = vpop.f32.mrf.mxu0  ;;  %v642_v27 = vpop.f32.mrf.mxu1 }
 0x258   : > { %v580_v28 = vadd.f32 %v963_v24, %v579_v26  ;;  %v643_v29 = vadd.f32 %v967_v25, %v642_v27 }
 0x259   : > { %v998_v30 = vpop.f32.mrf.mxu0  ;;  %v1006_v31 = vpop.f32.mrf.mxu1 }
 0x25a   : > { %v711_v32 = vmul.f32 0.17677669, %v580_v28  ;;  %v715_v33 = vpack.c.bf16 %v643_v29, %v643_v29 }
 0x25b   : > { %v582_v34 = vpop.f32.mrf.mxu0  ;;  %v645_v35 = vpop.f32.mrf.mxu1 }
 0x25c   : > { %v712_v36 = vpack.c.bf16 %v711_v32, %v711_v32  ;;  %716 = vst.msk [vmem:[%s477_s14] sm:$0xf] %vm713_vm2, %v715_v33  ;;  %s1391_s14 = smov [#allocation11]  }
 0x25d   : > { %v999_v37 = vpop.f32.mrf.mxu0  ;;  %v1007_v38 = vpop.f32.mrf.mxu1  ;;  %s1241_s7 = sshll.u32 %s1391_s14, 4  ;;  %s1242_s7 = int_to_ptr.vmem [resolvable:$false] %s1241_s7 }
 0x25e   : > { %s1243_s11 = scalar_lea.vmem %s1242_s7, 128  ;;  %p1244_p2 = scmp.lt.s32.totalorder %s1635_s15, %s1242_s7 }
 0x25f   : > { %p1245_p4 = scmp.lt.s32.totalorder %s1243_s11, %s1237_s23 }
 0x261   : > { %p1246_p6 = por %p1245_p4, %p1244_p2 }
 0x263   : > { %p1247_p12 = pnand %p1246_p6, %p1240_p13 }
 0x265   : > { %1250 = shalt.err (!%p1247_p12)
}
 0x266   : > { %s1251_s17 = scalar_lea.hbm %s1633_s20, 64  ;;  %s1255_s29 = scalar_lea.hbm %s1763_s10, 128 }
 0x267   : > { %p1252_p0 = scmp.ne.s32.totalorder %s1633_s20, %s1251_s17  ;;  %p1256_p7 = scmp.lt.s32.totalorder %s1633_s20, %s1763_s10 }
 0x268   : > { %p1257_p8 = scmp.lt.s32.totalorder %s1255_s29, %s1251_s17 }
 0x269   : > { %p1253_p3 = pnand %p1252_p0, %p1552_p5 }
 0x26a   : > { %p1258_p11 = por %p1257_p8, %p1256_p7 }
 0x26b   : > { %p1254_p10 = pneg %p1253_p3 }
 0x26d   : > { %p1259_p1 = pnand %p1258_p11, %p1254_p10 }
 0x26f   : > { %1262 = shalt.err (!%p1259_p1)
}
 0x270   : > { %1031 = dma.vmem_to_hbm [thread:$0]  (%p1552_p5), %s1635_s15, 64, %s1633_s20, %s1649_s16   ;;  %v705_v40 = vpop.f32.mrf.mxu0 }
 0x271   : > { %s1795_s24 = scalar_lea.vmem [#allocation10], %s1613_s27  ;;  %s484_s23 = scalar_lea.vmem [#allocation13], %s1613_s27 }
 0x272   : > { %714 = vst.msk [vmem:[%s1795_s24] sm:$0xf] %vm713_vm2, %v712_v36  ;;  %s1678_s7 = sshll.u32 %s484_s23, 4  ;;  %s720_s11 = scalar_lea.sflag [#allocation4], %s1582_s3  ;;  %s773_s7 = int_to_ptr.vmem [resolvable:$true] %s1678_s7 }
 0x273   : > { %s1263_s17 = scalar_lea.vmem %s1644_s5, 64  ;;  %s1392_s25 = smov [#allocation10]  }
 0x274   : > { %p1264_p9 = scmp.ne.s32.totalorder %s1644_s5, %s1263_s17  ;;  %s1267_s26 = sshll.u32 %s1392_s25, 4  ;;  %s1268_s26 = int_to_ptr.vmem [resolvable:$false] %s1267_s26 }
 0x275   : > { %s1269_s29 = scalar_lea.vmem %s1268_s26, 128  ;;  %p1270_p4 = scmp.lt.s32.totalorder %s1644_s5, %s1268_s26 }
 0x276   : > { %p1265_p13 = pnand %p1264_p9, %p1552_p5  ;;  %p1271_p6 = scmp.lt.s32.totalorder %s1269_s29, %s1263_s17 }
 0x278   : > { %p1266_p2 = pneg %p1265_p13  ;;  %p1272_p12 = por %p1271_p6, %p1270_p4 }
 0x27a   : > { %p1273_p0 = pnand %p1272_p12, %p1266_p2 }
 0x27c   : > { %1276 = shalt.err (!%p1273_p0)
}
 0x27d   : > { %s1277_s15 = scalar_lea.hbm %s1642_s13, 64  ;;  %s1281_s14 = scalar_lea.hbm %s1762_s9, 128 }
 0x27e   : > { %p1278_p3 = scmp.ne.s32.totalorder %s1642_s13, %s1277_s15  ;;  %p1282_p8 = scmp.lt.s32.totalorder %s1642_s13, %s1762_s9 }
 0x27f   : > { %p1283_p11 = scmp.lt.s32.totalorder %s1281_s14, %s1277_s15 }
 0x280   : > { %p1279_p10 = pnand %p1278_p3, %p1552_p5 }
 0x281   : > { %p1284_p1 = por %p1283_p11, %p1282_p8 }
 0x282   : > { %p1280_p7 = pneg %p1279_p10 }
 0x284   : > { %p1285_p9 = pnand %p1284_p1, %p1280_p7 }
 0x286   : > { %1288 = shalt.err (!%p1285_p9)
}
 0x287   : > { %1030 = dma.vmem_to_hbm [thread:$0]  (%p1552_p5), %s1644_s5, 64, %s1642_s13, %s720_s11   ;;  %v706_v41 = vadd.f32 %v971_v39, %v705_v40  ;;  %v1014_v42 = vpop.f32.mrf.mxu0 }
 0x288   : > { %s1796_s29 = sld [smem:[#allocation25_spill]]  ;;  %s1289_s15 = scalar_lea.vmem %s773_s7, 64 }
 0x289   : > { %v717_v43 = vpack.c.bf16 %v706_v41, %v706_v41  ;;  %v708_v44 = vpop.f32.mrf.mxu0  ;;  %p1290_p13 = scmp.ne.s32.totalorder %s773_s7, %s1289_s15  ;;  %s1393_s5 = smov [#allocation13]  }
 0x28a   : > { %s1293_s13 = sshll.u32 %s1393_s5, 4  ;;  %s1294_s13 = int_to_ptr.vmem [resolvable:$false] %s1293_s13 }
 0x28b   : > { %718 = vst.msk [vmem:[%s484_s23] sm:$0xf] %vm713_vm2, %v717_v43  ;;  %v1015_v45 = vpop.f32.mrf.mxu0  ;;  %p1291_p2 = pnand %p1290_p13, %p1552_p5  ;;  %s1295_s11 = scalar_lea.vmem %s1294_s13, 128 }
 0x28c   : > { %p1296_p6 = scmp.lt.s32.totalorder %s773_s7, %s1294_s13  ;;  %p1297_p12 = scmp.lt.s32.totalorder %s1295_s11, %s1289_s15 }
 0x28d   : > { %p1292_p4 = pneg %p1291_p2 }
 0x28e   : > { %s1705_s3 = scalar_lea.hbm %s1796_s29, %s1623_s28  ;;  %p1298_p0 = por %p1297_p12, %p1296_p6 }
 0x290   : > { %p1299_p3 = pnand %p1298_p0, %p1292_p4 }
 0x292   : > { %1302 = shalt.err (!%p1299_p3)
}
 0x293   : > { %s1303_s27 = scalar_lea.hbm %s1705_s3, 64  ;;  %s1307_s20 = scalar_lea.hbm %s1796_s29, 128 }
 0x294   : > { %p1304_p10 = scmp.ne.s32.totalorder %s1705_s3, %s1303_s27  ;;  %p1308_p11 = scmp.lt.s32.totalorder %s1705_s3, %s1796_s29 }
 0x295   : > { %p1309_p1 = scmp.lt.s32.totalorder %s1307_s20, %s1303_s27 }
 0x296   : > { %p1305_p7 = pnand %p1304_p10, %p1552_p5 }
 0x297   : > { %p1310_p9 = por %p1309_p1, %p1308_p11 }
 0x298   : > { %p1306_p8 = pneg %p1305_p7 }
 0x29a   : > { %p1311_p13 = pnand %p1310_p9, %p1306_p8 }
 0x29c   : > { %1314 = shalt.err (!%p1311_p13)
}
 0x29d   : > { %1032 = dma.vmem_to_hbm [thread:$0]  (%p1552_p5), %s773_s7, 64, %s1705_s3, %s1649_s16  }
 0x29e PF: > { %s1797_s25 = sld [smem:[#allocation19_spill]]  ;;  %p1800_p4 = scmp.ge.s32.totalorder %s1381_s22, 2 }
 0x29f   : > { %s1798_s17 = sld [smem:[#allocation20_spill]] }
 0x2a4   : > { %s784_s26 = sand.u32 1, %s1797_s25  }
 0x2a5   : > { %p1799_p2 = scmp.ne.s32.totalorder %s1798_s17, 0  ;;  %s785_s15 = scalar_lea.sflag [#allocation4], %s784_s26 }
 0x2a7   : > { %p1051_p6 = pnand %p1800_p4, %p1799_p2 }
 0x2a9   : > { %p1052_p12 = pneg %p1051_p6 }
 0x2ab   : > { %1352 = dma.done.wait (%p1052_p12), %s785_s15, 64  }
 0x2ac   : > { %1354 = vsyncadd (%p1052_p12), %s785_s15, 4294967232  ;;  %s1801_s5 = sadd.s32 4294967294, %s1381_s22  }
 0x2ad   : > { %s793_s13 = sand.u32 1, %s1801_s5  }
 0x2ae   : > { %s794_s11 = scalar_lea.sflag [#allocation12], %s793_s13 }
 0x2af   : > { %1356 = dma.done.wait (%p1052_p12), %s794_s11, 128  }
 0x2b0   : > { %1358 = vsyncadd (%p1052_p12), %s794_s11, 4294967168  ;;  %s33_s22 = sadd.s32 1, %s1381_s22   ;;  %s1802_s30 = sld [smem:[#allocation21_spill]] }
 0x2b1   : > { %p30_p5 = scmp.ge.s32.totalorder %s33_s22, 4   ;;  %s1803_s17 = smov %s1365_s18 }
 0x2b2   : > { %s1804_s18 = smov %s1369_s19  ;;  %s1805_s19 = smov %s1564_s12 }
 0x2b3   : > { %s1806_s20 = smov %s1377_s21  ;;  %32 = sbr.rel (!%p30_p5) target bundleno = 15 (0xf), region = 145 }
 0x2b6   : > { %s1807_s21 = smov %s1802_s30 }
 0x2b8   :  { %808 = vsyncpa [#allocation3], 1 }
 0x2b9   :  { %810 = vsyncpa [#allocation3 + $0x1], 1 }
 0x2ba   :  { %811 = vsyncpa [#allocation6], 1 }
 0x2bb   :  { %812 = vsyncpa [#allocation9], 1 }
 0x2bc   :  { %813 = vsyncpa [#allocation4], 1 }
 0x2bd   :  { %815 = vsyncpa [#allocation4 + $0x1], 1 }
 0x2be   :  { %816 = vsyncpa [#allocation12], 1 }
 0x2bf   :  { %818 = vsyncpa [#allocation12 + $0x1], 1 }

</bundles_post_ra>
